<compile_context>
chip_gen: v7x
topology: tpu7x:2x2x1
jax: 0.10.0
libtpu: 0.0.40
codegen_flags: <defaults>
</compile_context>

<pallas_src>
import functools

import jax
import jax.numpy as jnp
from jax.experimental import pallas as pl
from jax.experimental.pallas import tpu as pltpu


def _encoder_kernel(x_ref,
                    w1_ref, b1_ref,
                    w2_ref, b2_ref,
                    w3_ref, b3_ref,
                    w4_ref, b4_ref,
                    o_ref):
    """Fused 4x (matmul + bias) with ReLU between layers; all tiles in VMEM."""
    cdt = w1_ref.dtype                       # bf16 compute dtype (f32 accum)
    h = x_ref[...].astype(cdt)               # cast in-register, not in XLA
    h = jnp.dot(h, w1_ref[...], preferred_element_type=jnp.float32) + b1_ref[...]
    h = jnp.maximum(h, 0.0).astype(cdt)
    h = jnp.dot(h, w2_ref[...], preferred_element_type=jnp.float32) + b2_ref[...]
    h = jnp.maximum(h, 0.0).astype(cdt)
    h = jnp.dot(h, w3_ref[...], preferred_element_type=jnp.float32) + b3_ref[...]
    h = jnp.maximum(h, 0.0).astype(cdt)
    h = jnp.dot(h, w4_ref[...], preferred_element_type=jnp.float32) + b4_ref[...]
    o_ref[...] = h.astype(o_ref.dtype)


def _round_up(n, m):
    return ((n + m - 1) // m) * m


@functools.partial(
    jax.jit,
    static_argnames=("block_m", "compute_dtype", "vmem_limit_bytes"))
def sparse_ae_encoder(x, params, *, block_m=512, compute_dtype=jnp.bfloat16,
                      vmem_limit_bytes=None):
    """x: [M, d_model].  params: dict of w_i [in, out], b_i [1, out]."""
    M, d_model = x.shape
    ws = [params[f"w{i}"].astype(compute_dtype) for i in range(1, 5)]
    bs = [params[f"b{i}"].astype(jnp.float32) for i in range(1, 5)]
    d_out = ws[3].shape[1]
    out_dtype = x.dtype

    # --- Batch tile choice -------------------------------------------------
    # As large as possible (amortizes ~0.35us/step overhead, fills MXU
    # sublanes, batches the lane-narrow output stores into one tall slab),
    # but split into >= 2 grid steps whenever the batch would otherwise fit
    # in <= 2 tiles, so dimension_semantics=("parallel",) can use both of
    # v7x's TensorCores.  Multiple of 16 covers bf16 callers too.
    m_ceil = _round_up(M, 16)
    if m_ceil <= 16:
        m_tile = m_ceil
    elif m_ceil <= 2 * block_m:
        m_tile = _round_up(pl.cdiv(m_ceil, 2), 16)
    else:
        m_tile = block_m
    grid_m = pl.cdiv(M, m_tile)   # ragged last block: OOB writes discarded

    # --- VMEM budget (always set explicitly; defaults are 16/32 MiB) -------
    if vmem_limit_bytes is None:
        weight_bytes = sum(int(w.size) * w.dtype.itemsize for w in ws)
        bias_bytes = sum(int(b.size) * b.dtype.itemsize for b in bs)
        x_tile_bytes = m_tile * d_model * x.dtype.itemsize
        out_tile_bytes = m_tile * d_out * jnp.dtype(out_dtype).itemsize
        inter_bytes = 6 * m_tile * d_model        # f32+bf16 hidden activations
        vmem_limit_bytes = int(weight_bytes + bias_bytes
                               + 2 * x_tile_bytes + 2 * out_tile_bytes
                               + inter_bytes + (2 << 20))
        vmem_limit_bytes = min(max(vmem_limit_bytes, 16 << 20), 128 << 20)

    # Grid-invariant operands (weights / biases): VMEM-resident, single
    # buffered so they don't pay the default 2x double-buffer footprint.
    # Mandatory -- fails loudly (AttributeError) if this jax lacks Buffered.
    def const_spec(shape):
        return pl.BlockSpec(shape, lambda i: (0, 0),
                            pipeline_mode=pl.Buffered(1))

    out = pl.pallas_call(
        _encoder_kernel,
        out_shape=jax.ShapeDtypeStruct((M, d_out), out_dtype),
        grid_spec=pltpu.PrefetchScalarGridSpec(
            num_scalar_prefetch=0,
            grid=(grid_m,),
            in_specs=[
                pl.BlockSpec((m_tile, d_model), lambda i: (i, 0)),
                const_spec(ws[0].shape), const_spec(bs[0].shape),
                const_spec(ws[1].shape), const_spec(bs[1].shape),
                const_spec(ws[2].shape), const_spec(bs[2].shape),
                const_spec(ws[3].shape), const_spec(bs[3].shape),
            ],
            out_specs=pl.BlockSpec((m_tile, d_out), lambda i: (i, 0)),
        ),
        compiler_params=pltpu.CompilerParams(
            dimension_semantics=("parallel",),
            vmem_limit_bytes=vmem_limit_bytes),
    )(x, ws[0], bs[0], ws[1], bs[1], ws[2], bs[2], ws[3], bs[3])
    return out


def init_params(key, d_model, dtype=jnp.float32):
    """Deterministic init mirroring nn.Linear shapes (weights stored [in, out])."""
    if d_model % 16 != 0:
        raise ValueError("d_model must be divisible by 16 for the /2,/4,/8,/16 stack")
    dims = [d_model, d_model // 2, d_model // 4, d_model // 8, d_model // 16]
    params = {}
    for idx in range(4):
        fan_in, fan_out = dims[idx], dims[idx + 1]
        key, kw, kb = jax.random.split(key, 3)
        bound = 1.0 / (fan_in ** 0.5)
        params[f"w{idx + 1}"] = jax.random.uniform(
            kw, (fan_in, fan_out), dtype, minval=-bound, maxval=bound)
        params[f"b{idx + 1}"] = jax.random.uniform(
            kb, (1, fan_out), dtype, minval=-bound, maxval=bound)
    return params


def _reference_f32(x, params):
    h = x
    for i in range(1, 5):
        h = h @ params[f"w{i}"] + params[f"b{i}"]
        if i < 4:
            h = jnp.maximum(h, 0.0)
    return h


if __name__ == "__main__":
    d_model = 256          # hidden dims 128, 64, 32; output dim 16
    batch = 16             # small demo batch -> one grid step (m_tile = 16)
    key = jax.random.PRNGKey(0)
    kx, kp = jax.random.split(key)

    x = jax.random.normal(kx, (batch, d_model), jnp.float32)
    params = init_params(kp, d_model)

    out = jax.block_until_ready(sparse_ae_encoder(x, params))

    ref = _reference_f32(x, params)
    assert out.shape == (batch, d_model // 16), out.shape
    # bf16 matmul operands with f32 accumulation -> bf16-level tolerance
    # (scale with d_model if testing larger configs).
    tol = 2e-2 * max(1.0, d_model / 256.0)
    assert jnp.allclose(out, ref, atol=tol, rtol=tol), (
        float(jnp.max(jnp.abs(out - ref))))

    # Ragged-batch sanity check (partial last grid block, no wrapper pad).
    x2 = jax.random.normal(kx, (37, d_model), jnp.float32)
    out2 = jax.block_until_ready(sparse_ae_encoder(x2, params, block_m=16))
    assert out2.shape == (37, d_model // 16)
    assert jnp.allclose(out2, _reference_f32(x2, params), atol=tol, rtol=tol)

    print("KERNEL_OK")
</pallas_src>

<mosaic_0001>
module attributes {stable_mosaic.version = 11 : i64} {
  func.func @_encoder_kernel(%arg0: i32, %arg1: memref<16x256xf32, #tpu.memory_space<vmem>>, %arg2: memref<256x128xbf16, #tpu.memory_space<vmem>>, %arg3: memref<1x128xf32, #tpu.memory_space<vmem>>, %arg4: memref<128x64xbf16, #tpu.memory_space<vmem>>, %arg5: memref<1x64xf32, #tpu.memory_space<vmem>>, %arg6: memref<64x32xbf16, #tpu.memory_space<vmem>>, %arg7: memref<1x32xf32, #tpu.memory_space<vmem>>, %arg8: memref<32x16xbf16, #tpu.memory_space<vmem>>, %arg9: memref<1x16xf32, #tpu.memory_space<vmem>>, %arg10: memref<16x16xf32, #tpu.memory_space<vmem>>) attributes {dimension_semantics = [#tpu.dimension_semantics<parallel>], iteration_bounds = array<i64: 1>, scalar_prefetch = 0 : i64, scratch_operands = 0 : i64, tpu.core_type = #tpu.core_type<tc>, window_params = [{transform_indices = @transform_0, window_bounds = array<i64: 16, 256>}, {pipeline_mode = #tpu.pipeline_mode<synchronous>, transform_indices = @transform_1, window_bounds = array<i64: 256, 128>}, {pipeline_mode = #tpu.pipeline_mode<synchronous>, transform_indices = @transform_2, window_bounds = array<i64: 1, 128>}, {pipeline_mode = #tpu.pipeline_mode<synchronous>, transform_indices = @transform_3, window_bounds = array<i64: 128, 64>}, {pipeline_mode = #tpu.pipeline_mode<synchronous>, transform_indices = @transform_4, window_bounds = array<i64: 1, 64>}, {pipeline_mode = #tpu.pipeline_mode<synchronous>, transform_indices = @transform_5, window_bounds = array<i64: 64, 32>}, {pipeline_mode = #tpu.pipeline_mode<synchronous>, transform_indices = @transform_6, window_bounds = array<i64: 1, 32>}, {pipeline_mode = #tpu.pipeline_mode<synchronous>, transform_indices = @transform_7, window_bounds = array<i64: 32, 16>}, {pipeline_mode = #tpu.pipeline_mode<synchronous>, transform_indices = @transform_8, window_bounds = array<i64: 1, 16>}, {transform_indices = @transform_9, window_bounds = array<i64: 16, 16>}]} {
    %c0 = arith.constant 0 : index
    %c0_0 = arith.constant 0 : index
    %0 = vector.load %arg1[%c0, %c0_0] : memref<16x256xf32, #tpu.memory_space<vmem>>, vector<16x256xf32>
    %1 = arith.truncf %0 : vector<16x256xf32> to vector<16x256xbf16>
    %c0_1 = arith.constant 0 : index
    %c0_2 = arith.constant 0 : index
    %2 = vector.load %arg2[%c0_1, %c0_2] : memref<256x128xbf16, #tpu.memory_space<vmem>>, vector<256x128xbf16>
    %cst = arith.constant dense<0.000000e+00> : vector<16x128xf32>
    %3 = tpu.matmul %1, %2, %cst {dimension_numbers = #tpu.dot_dimension_numbers<[1], [0], [0], [1], [0, 0, 1, 1], [], []>} : vector<16x256xbf16>, vector<256x128xbf16>, vector<16x128xf32> -> vector<16x128xf32>
    %c0_3 = arith.constant 0 : index
    %c0_4 = arith.constant 0 : index
    %4 = vector.load %arg3[%c0_3, %c0_4] : memref<1x128xf32, #tpu.memory_space<vmem>>, vector<1x128xf32>
    %5 = vector.broadcast %4 : vector<1x128xf32> to vector<16x128xf32>
    %6 = arith.addf %3, %5 : vector<16x128xf32>
    %cst_5 = arith.constant 0.000000e+00 : f32
    %7 = vector.broadcast %cst_5 : f32 to vector<16x128xf32>
    %8 = arith.maximumf %6, %7 : vector<16x128xf32>
    %9 = arith.truncf %8 : vector<16x128xf32> to vector<16x128xbf16>
    %c0_6 = arith.constant 0 : index
    %c0_7 = arith.constant 0 : index
    %10 = vector.load %arg4[%c0_6, %c0_7] : memref<128x64xbf16, #tpu.memory_space<vmem>>, vector<128x64xbf16>
    %cst_8 = arith.constant dense<0.000000e+00> : vector<16x64xf32>
    %11 = tpu.matmul %9, %10, %cst_8 {dimension_numbers = #tpu.dot_dimension_numbers<[1], [0], [0], [1], [0, 0, 1, 1], [], []>} : vector<16x128xbf16>, vector<128x64xbf16>, vector<16x64xf32> -> vector<16x64xf32>
    %c0_9 = arith.constant 0 : index
    %c0_10 = arith.constant 0 : index
    %12 = vector.load %arg5[%c0_9, %c0_10] : memref<1x64xf32, #tpu.memory_space<vmem>>, vector<1x64xf32>
    %13 = vector.broadcast %12 : vector<1x64xf32> to vector<16x64xf32>
    %14 = arith.addf %11, %13 : vector<16x64xf32>
    %cst_11 = arith.constant 0.000000e+00 : f32
    %15 = vector.broadcast %cst_11 : f32 to vector<16x64xf32>
    %16 = arith.maximumf %14, %15 : vector<16x64xf32>
    %17 = arith.truncf %16 : vector<16x64xf32> to vector<16x64xbf16>
    %c0_12 = arith.constant 0 : index
    %c0_13 = arith.constant 0 : index
    %18 = vector.load %arg6[%c0_12, %c0_13] : memref<64x32xbf16, #tpu.memory_space<vmem>>, vector<64x32xbf16>
    %cst_14 = arith.constant dense<0.000000e+00> : vector<16x32xf32>
    %19 = tpu.matmul %17, %18, %cst_14 {dimension_numbers = #tpu.dot_dimension_numbers<[1], [0], [0], [1], [0, 0, 1, 1], [], []>} : vector<16x64xbf16>, vector<64x32xbf16>, vector<16x32xf32> -> vector<16x32xf32>
    %c0_15 = arith.constant 0 : index
    %c0_16 = arith.constant 0 : index
    %20 = vector.load %arg7[%c0_15, %c0_16] : memref<1x32xf32, #tpu.memory_space<vmem>>, vector<1x32xf32>
    %21 = vector.broadcast %20 : vector<1x32xf32> to vector<16x32xf32>
    %22 = arith.addf %19, %21 : vector<16x32xf32>
    %cst_17 = arith.constant 0.000000e+00 : f32
    %23 = vector.broadcast %cst_17 : f32 to vector<16x32xf32>
    %24 = arith.maximumf %22, %23 : vector<16x32xf32>
    %25 = arith.truncf %24 : vector<16x32xf32> to vector<16x32xbf16>
    %c0_18 = arith.constant 0 : index
    %c0_19 = arith.constant 0 : index
    %26 = vector.load %arg8[%c0_18, %c0_19] : memref<32x16xbf16, #tpu.memory_space<vmem>>, vector<32x16xbf16>
    %cst_20 = arith.constant dense<0.000000e+00> : vector<16x16xf32>
    %27 = tpu.matmul %25, %26, %cst_20 {dimension_numbers = #tpu.dot_dimension_numbers<[1], [0], [0], [1], [0, 0, 1, 1], [], []>} : vector<16x32xbf16>, vector<32x16xbf16>, vector<16x16xf32> -> vector<16x16xf32>
    %c0_21 = arith.constant 0 : index
    %c0_22 = arith.constant 0 : index
    %28 = vector.load %arg9[%c0_21, %c0_22] : memref<1x16xf32, #tpu.memory_space<vmem>>, vector<1x16xf32>
    %29 = vector.broadcast %28 : vector<1x16xf32> to vector<16x16xf32>
    %30 = arith.addf %27, %29 : vector<16x16xf32>
    %c0_23 = arith.constant 0 : index
    %c0_24 = arith.constant 0 : index
    %31 = vector.load %arg10[%c0_23, %c0_24] : memref<16x16xf32, #tpu.memory_space<vmem>>, vector<16x16xf32>
    tpu.vector_store %arg10[%c0_23, %c0_24], %30 {strides = array<i32>} : memref<16x16xf32, #tpu.memory_space<vmem>>, vector<16x16xf32>,
    return
  }
  func.func @transform_0(%arg0: i32) -> (i32, i32) {
    %c0_i32 = arith.constant 0 : i32
    %c0_i32_0 = arith.constant 0 : i32
    return %arg0, %c0_i32 : i32, i32
  }
  func.func @transform_1(%arg0: i32) -> (i32, i32) {
    %c0_i32 = arith.constant 0 : i32
    %c0_i32_0 = arith.constant 0 : i32
    %c0_i32_1 = arith.constant 0 : i32
    return %c0_i32, %c0_i32_0 : i32, i32
  }
  func.func @transform_2(%arg0: i32) -> (i32, i32) {
    %c0_i32 = arith.constant 0 : i32
    %c0_i32_0 = arith.constant 0 : i32
    %c0_i32_1 = arith.constant 0 : i32
    return %c0_i32, %c0_i32_0 : i32, i32
  }
  func.func @transform_3(%arg0: i32) -> (i32, i32) {
    %c0_i32 = arith.constant 0 : i32
    %c0_i32_0 = arith.constant 0 : i32
    %c0_i32_1 = arith.constant 0 : i32
    return %c0_i32, %c0_i32_0 : i32, i32
  }
  func.func @transform_4(%arg0: i32) -> (i32, i32) {
    %c0_i32 = arith.constant 0 : i32
    %c0_i32_0 = arith.constant 0 : i32
    %c0_i32_1 = arith.constant 0 : i32
    return %c0_i32, %c0_i32_0 : i32, i32
  }
  func.func @transform_5(%arg0: i32) -> (i32, i32) {
    %c0_i32 = arith.constant 0 : i32
    %c0_i32_0 = arith.constant 0 : i32
    %c0_i32_1 = arith.constant 0 : i32
    return %c0_i32, %c0_i32_0 : i32, i32
  }
  func.func @transform_6(%arg0: i32) -> (i32, i32) {
    %c0_i32 = arith.constant 0 : i32
    %c0_i32_0 = arith.constant 0 : i32
    %c0_i32_1 = arith.constant 0 : i32
    return %c0_i32, %c0_i32_0 : i32, i32
  }
  func.func @transform_7(%arg0: i32) -> (i32, i32) {
    %c0_i32 = arith.constant 0 : i32
    %c0_i32_0 = arith.constant 0 : i32
    %c0_i32_1 = arith.constant 0 : i32
    return %c0_i32, %c0_i32_0 : i32, i32
  }
  func.func @transform_8(%arg0: i32) -> (i32, i32) {
    %c0_i32 = arith.constant 0 : i32
    %c0_i32_0 = arith.constant 0 : i32
    %c0_i32_1 = arith.constant 0 : i32
    return %c0_i32, %c0_i32_0 : i32, i32
  }
  func.func @transform_9(%arg0: i32) -> (i32, i32) {
    %c0_i32 = arith.constant 0 : i32
    %c0_i32_0 = arith.constant 0 : i32
    return %arg0, %c0_i32 : i32, i32
  }
}

</mosaic_0001>

<bundles_post_ra>
// kernel: sparse_ae_encoder.1
= control target key start
LH: loop header
LB: loop body
LE: loop exit
PB: predicated region body
PF: predicated region fallthrough
CT: control target
= control target key end

     0   :  { %v682_v2 = vmov 0.0   ;;  %s883_s0 = inlined_call_operand.vmem [shape: f32[16,256], index: 0, kind: input, shape index: {}]   ;;  %s884_s1 = inlined_call_operand.vmem [shape: bf16[256,128], index: 1, kind: input, shape index: {}]   ;;  %s885_s2 = inlined_call_operand.vmem [shape: f32[1,128], index: 2, kind: input, shape index: {}]   ;;  %s886_s3 = inlined_call_operand.vmem [shape: bf16[128,64], index: 3, kind: input, shape index: {}]   ;;  %s887_s4 = inlined_call_operand.vmem [shape: f32[1,64], index: 4, kind: input, shape index: {}]   ;;  %s888_s5 = inlined_call_operand.vmem [shape: bf16[64,32], index: 5, kind: input, shape index: {}]   ;;  %s889_s6 = inlined_call_operand.vmem [shape: f32[1,32], index: 6, kind: input, shape index: {}]   ;;  %s890_s7 = inlined_call_operand.vmem [shape: bf16[32,16], index: 7, kind: input, shape index: {}]   ;;  %s891_s8 = inlined_call_operand.vmem [shape: f32[1,16], index: 8, kind: input, shape index: {}]   ;;  %s892_s9 = inlined_call_operand.hbm [shape: f32[16,16], index: 9, kind: output, shape index: {}]  }
   0x1   :  { %v628_v0 = vld [vmem:[%s884_s1 + $0x40] sm:$0xff]   ;;  %583 = vmatprep.subr.bf16.mxu1 %v682_v2  ;;  %v630_v3 = vld [vmem:[%s884_s1 + $0x48] sm:$0xff]   ;;  %v632_v5 = vld [vmem:[%s884_s1 + $0x50] sm:$0xff]  }
   0x2   :  { %v629_v1 = vld [vmem:[%s884_s1] sm:$0xff]   ;;  %544 = vmatprep.subr.bf16.mxu0 %v628_v0  ;;  %v631_v4 = vld [vmem:[%s884_s1 + $0x8] sm:$0xff]   ;;  %v633_v6 = vld [vmem:[%s884_s1 + $0x10] sm:$0xff]  }
   0x3   :  { %545 = vmatpush3.bf16.msra.mxu0 %v629_v1  ;;  %v634_v7 = vld [vmem:[%s884_s1 + $0x58] sm:$0xff]   ;;  %v636_v9 = vld [vmem:[%s884_s1 + $0x60] sm:$0xff]   ;;  %v638_v11 = vld [vmem:[%s884_s1 + $0x68] sm:$0xff]  }
   0x4   :  { %546 = vmatprep.subr.bf16.mxu0 %v630_v3  ;;  %v635_v8 = vld [vmem:[%s884_s1 + $0x18] sm:$0xff]   ;;  %v637_v10 = vld [vmem:[%s884_s1 + $0x20] sm:$0xff]   ;;  %v35_v12 = vld [vmem:[%s883_s0 + $0x8] sm:$0xff] }
   0x5   :  { %v37_v13 = vld [vmem:[%s883_s0 + $0x18] sm:$0xff]  ;;  %v639_v14 = vld [vmem:[%s884_s1 + $0x28] sm:$0xff]   ;;  %v644_v16 = vld [vmem:[%s886_s3] sm:$0xff]  }
   0x6   :  { %v39_v15 = vpack.c.bf16 %v37_v13, %v35_v12  ;;  %v640_v17 = vld [vmem:[%s884_s1 + $0x70] sm:$0xff]   ;;  %584 = vmatpush3.bf16.msra.mxu1 %v644_v16  ;;  %v645_v18 = vld [vmem:[%s886_s3 + $0x8] sm:$0xff]   ;;  %v642_v20 = vld [vmem:[%s884_s1 + $0x78] sm:$0xff]  }
   0x7   :  { %547 = vmatpush3.bf16.msra.mxu0 %v631_v4  ;;  %v641_v19 = vld [vmem:[%s884_s1 + $0x30] sm:$0xff]   ;;  %585 = vmatprep.subr.bf16.mxu1 %v682_v2  ;;  %v643_v22 = vld [vmem:[%s884_s1 + $0x38] sm:$0xff]   ;;  %v34_v23 = vld [vmem:[%s883_s0] sm:$0xff] }
   0x8   :  { %548 = vmatprep.subr.bf16.mxu0 %v632_v5  ;;  %207 = vmatprep.mubr.bf16.mxu0 %v39_v15  ;;  %v646_v21 = vld [vmem:[%s886_s3 + $0x10] sm:$0xff]   ;;  %v647_v25 = vld [vmem:[%s886_s3 + $0x18] sm:$0xff]  }
   0x9   :  { %v36_v24 = vld [vmem:[%s883_s0 + $0x10] sm:$0xff] }
   0xa   :  { %586 = vmatpush3.bf16.msra.mxu1 %v645_v18 }
   0xb   :  { %549 = vmatpush3.bf16.msra.mxu0 %v633_v6  ;;  %587 = vmatprep.subr.bf16.mxu1 %v682_v2 }
   0xc   :  { %550 = vmatprep.subr.bf16.mxu0 %v634_v7 }
   0xe   :  { %588 = vmatpush3.bf16.msra.mxu1 %v646_v21 }
   0xf   :  { %551 = vmatpush3.bf16.msra.mxu0 %v635_v8 }
  0x10   :  { %552 = vmatprep.subr.bf16.mxu0 %v636_v9 }
  0x13   :  { %553 = vmatpush3.bf16.msra.mxu0 %v637_v10 }
  0x14   :  { %554 = vmatprep.subr.bf16.mxu0 %v638_v11 }
  0x17   :  { %555 = vmatpush3.bf16.msra.mxu0 %v639_v14 }
  0x18   :  { %556 = vmatprep.subr.bf16.mxu0 %v640_v17 }
  0x1b   :  { %557 = vmatpush3.bf16.msra.mxu0 %v641_v19 }
  0x1c   :  { %558 = vmatprep.subr.bf16.mxu0 %v642_v20 }
  0x1d   :  { %14 = vsyncpa [#allocation3], 0  ;;  %589 = vmatprep.subr.bf16.mxu1 %v682_v2  ;;  %v38_v26 = vpack.c.bf16 %v36_v24, %v34_v23  ;;  %v648_v27 = vld [vmem:[%s886_s3 + $0x20] sm:$0xff]   ;;  %v649_v28 = vld [vmem:[%s886_s3 + $0x28] sm:$0xff]   ;;  %vm683_vm0 = vmmov 0   ;;  %vm373_vm1 = vcmask 523264  }
  0x1e   :  { %590 = vmatpush3.bf16.msra.mxu1 %v647_v25  ;;  %v650_v29 = vld [vmem:[%s886_s3 + $0x30] sm:$0xff]   ;;  %v651_v30 = vld [vmem:[%s886_s3 + $0x38] sm:$0xff]   ;;  %599 = vmatprep.mubr.msk.bf16.mxu1 %vm683_vm0, %v682_v2  ;;  %v652_v31 = vld [vmem:[%s888_s5] sm:$0xff]   ;;  %vm444_vm2 = vcmask 261120   ;;  %vm489_vm3 = vcmask 130048  }
  0x1f   :  { %559 = vmatpush3.bf16.msra.mxu0 %v643_v22  ;;  %591 = vmatprep.subr.bf16.mxu1 %v682_v2  ;;  %v653_v32 = vld [vmem:[%s888_s5 + $0x8] sm:$0xff]   ;;  %v508_v34 = vld [vmem:[%s885_s2] ss:$0 sm:$0xff]  ;;  %v654_v45 = vld [vmem:[%s888_s5 + $0x10] sm:$0xff]  }
  0x20   :  { %603 = vmatprep.subr.bf16.mxu0 %v682_v2  ;;  %v655_v46 = vld [vmem:[%s888_s5 + $0x18] sm:$0xff]   ;;  %v525_v47 = vld [vmem:[%s887_s4] ss:$0 sm:$0xff]  ;;  %v657_v58 = vld [vmem:[%s890_s7 + $0x8] sm:$0xff]  }
  0x21   :  { %v656_v57 = vld [vmem:[%s890_s7] sm:$0xff]   ;;  %s684_s7 = smov [#allocation2]  }
  0x22   :  { %208 = vmatmul.mubr.bf16.vlgmr.msra.gmra.mrb[0].mxu0 %v38_v26  ;;  %592 = vmatpush3.bf16.msra.mxu1 %v648_v27  ;;  %v534_v59 = vld [vmem:[%s889_s6] ss:$0 sm:$0xff]  ;;  %s497_s15 = sshll.u32 %s684_s7, 4  ;;  %s498_s15 = int_to_ptr.vmem [resolvable:$true] %s497_s15 }
  0x23   :  { %593 = vmatprep.subr.bf16.mxu1 %v682_v2  ;;  %611 = vmatprep.mubr.msk.bf16.mxu0 %vm683_vm0, %v682_v2  ;;  %s658_s6 = scalar_lea.vmem %s498_s15, 256  ;;  %p663_p1 = scmp.lt.s32.totalorder %s498_s15, %s498_s15 }
  0x24   :  { %604 = vmatpush3.bf16.msra.mxu0 %v652_v31  ;;  %p659_p0 = scmp.ne.s32.totalorder %s498_s15, %s658_s6  ;;  %p664_p2 = scmp.lt.s32.totalorder %s658_s6, %s658_s6 }
  0x25   :  { %605 = vmatprep.subr.bf16.mxu0 %v682_v2 }
  0x26   :  { %594 = vmatpush3.bf16.msra.mxu1 %v649_v28  ;;  %p665_p3 = por %p664_p2, %p663_p1 }
  0x27   :  { %595 = vmatprep.subr.bf16.mxu1 %v682_v2 }
  0x28   :  { %606 = vmatpush3.bf16.msra.mxu0 %v653_v32  ;;  %p666_p4 = pnand %p665_p3, %p659_p0 }
  0x29   :  { %607 = vmatprep.subr.bf16.mxu0 %v682_v2 }
  0x2a   :  { %596 = vmatpush3.bf16.msra.mxu1 %v650_v29 }
  0x2b   :  { %597 = vmatprep.subr.bf16.mxu1 %v682_v2 }
  0x2c   :  { %608 = vmatpush3.bf16.msra.mxu0 %v654_v45 }
  0x2d   :  { %609 = vmatprep.subr.bf16.mxu0 %v682_v2 }
  0x2e   :  { %598 = vmatpush3.bf16.msra.mxu1 %v651_v30 }
  0x2f   :  { %615 = vmatprep.subr.bf16.mxu1 %v682_v2 }
  0x30   :  { %610 = vmatpush3.bf16.msra.mxu0 %v655_v46 }
  0xf5   :  { %v560_v33 = vpop.f32.mrb[0].mxu0 }
  0xf6   :  { %v561_v35 = vpop.f32.mrb[1].mxu0 }
  0xf7   :  { %v562_v36 = vadd.f32 %v561_v35, %v560_v33  ;;  %v563_v37 = vpop.f32.mrb[2].mxu0 }
  0xf8   :  { %v564_v38 = vpop.f32.mrb[3].mxu0 }
  0xf9   :  { %v210_v39 = vadd.f32 %v562_v36, %v508_v34  ;;  %v565_v40 = vadd.f32 %v564_v38, %v563_v37 }
  0xfb   :  { %v213_v41 = vadd.f32 %v565_v40, %v508_v34  ;;  %v216_v42 = vmax.f32 %v210_v39, 0.0 }
  0xfd   :  { %v217_v43 = vmax.f32 %v213_v41, 0.0 }
  0xff   :  { %v218_v44 = vpack.c.bf16 %v217_v43, %v216_v42 }
 0x101   :  { %600 = vmatmul.mubr.bf16.vlgmr.msra.gmra.mrb[0].mxu1 %v218_v44 }
 0x102   :  { %619 = vmatprep.mubr.msk.bf16.mxu1 %vm683_vm0, %v682_v2  ;;  %616 = vmatpush3.bf16.msra.mxu1 %v656_v57 }
 0x103   :  { %617 = vmatprep.subr.bf16.mxu1 %v682_v2  ;;  %v540_v2 = vld [vmem:[%s891_s8] ss:$0 sm:$0xff] }
 0x106   :  { %618 = vmatpush3.bf16.msra.mxu1 %v657_v58 }
 0x1d4   :  { %v324_v48 = vpop.f32.mrb[0].mxu1 }
 0x1d5   :  { %v325_v49 = vadd.f32 %v525_v47, %v324_v48  ;;  %v601_v50 = vpop.f32.mrb[1].mxu1 }
 0x1d6   :  { %v327_v51 = vpop.f32.mrb[2].mxu1 }
 0x1d7   :  { %v328_v52 = vadd.f32 %v525_v47, %v327_v51  ;;  %v602_v53 = vpop.f32.mrb[3].mxu1  ;;  %v331_v54 = vmax.f32 %v325_v49, 0.0 }
 0x1d9   :  { %v332_v55 = vmax.f32 %v328_v52, 0.0 }
 0x1db   :  { %v333_v56 = vpack.c.bf16 %v332_v55, %v331_v54 }
 0x1dd   :  { %612 = vmatmul.mubr.msk.bf16.vlgmr.msra.gmra.mrb[4].mxu0 %vm373_vm1, %v333_v56 }
 0x2b0   :  { %v411_v60 = vpop.f32.mrb[4].mxu0 }
 0x2b1   :  { %v412_v61 = vadd.f32 %v534_v59, %v411_v60  ;;  %v613_v62 = vpop.f32.mrb[5].mxu0 }
 0x2b2   :  { %v414_v63 = vpop.f32.mrb[6].mxu0 }
 0x2b3   :  { %v415_v0 = vadd.f32 %v534_v59, %v414_v63  ;;  %v614_v1 = vpop.f32.mrb[7].mxu0  ;;  %v418_v3 = vmax.f32 %v412_v61, 0.0 }
 0x2b5   :  { %v419_v4 = vmax.f32 %v415_v0, 0.0 }
 0x2b7   :  { %v420_v5 = vpack.c.bf16 %v419_v4, %v418_v3 }
 0x2b9   :  { %620 = vmatmul.mubr.msk.bf16.vlgmr.msra.gmra.mrb[4].mxu1 %vm444_vm2, %v420_v5 }
 0x38c   :  { %v482_v6 = vpop.f32.mrb[4].mxu1 }
 0x38d   :  { %v483_v7 = vadd.f32 %v540_v2, %v482_v6  ;;  %v621_v8 = vpop.f32.mrb[5].mxu1 }
 0x38e   :  { %v485_v9 = vpop.f32.mrb[6].mxu1 }
 0x38f   :  { %490 = vst.msk [vmem:[#allocation2] sm:$0xff] %vm489_vm3, %v483_v7  ;;  %v486_v10 = vadd.f32 %v540_v2, %v485_v9  ;;  %v622_v11 = vpop.f32.mrb[7].mxu1 }
 0x391   :  { %491 = vst.msk [vmem:[#allocation2 + $0x8] sm:$0xff] %vm489_vm3, %v486_v10 }
 0x392   :  { %669 = shalt.err (!%p666_p4)
}
 0x393   :  { %s670_s16 = scalar_lea.hbm %s892_s9, 256 }
 0x394   :  { %p671_p5 = scmp.ne.s32.totalorder %s892_s9, %s670_s16  ;;  %p674_p6 = scmp.lt.u32.totalorder %s670_s16, %s892_s9 }
 0x396   :  { %p676_p7 = pnand %p674_p6, %p671_p5 }
 0x398   :  { %679 = shalt.err (!%p676_p7)
}
 0x399   :  { %s685_s21 = smov 128   ;;  %s686_s22 = smov 8  }
 0x39a   :  { %503 = dma.vmem_to_hbm [thread:$0]  %s498_s15, 256, %s892_s9, [#allocation3], %s685_s21, %s685_s21, %s686_s22  }
 0x39b   :  { %680 = dma.done.wait [#allocation3], 256  }
 0x39c   :  { %681 = vsyncadd [#allocation3], 4294967040 }
 0x39d   :  { %507 = vsyncpa [#allocation3], 1 }

</bundles_post_ra>
